<compile_context>
chip_gen: v5e
topology: v5e:2x2
jax: 0.10.0
libtpu: 0.0.40
codegen_flags: <defaults>
</compile_context>

<pallas_src>
import functools

import jax
import jax.numpy as jnp
from jax.experimental import pallas as pl
from jax.experimental.pallas import tpu as pltpu


def flash_mhsa_kernel(xq_ref, xkv_ref, wq_ref, wkv_ref, wp_ref, bp_ref,
                      o_ref, q_scr, m_scr, l_scr, acc_scr,
                      *, num_heads, head_dim, scale):
    """One grid step (b, qi, ki) of fused flash MHSA.

    xq_ref  : (tq, D)  bf16  query rows   of batch b, q-tile  qi
    xkv_ref : (tk, D)  bf16  key/val rows of batch b, kv-tile ki
    wq_ref  : (D, D)   bf16  Q projection
    wkv_ref : (D, 2D)  bf16  [K | V] projection
    wp_ref  : (D, D)   bf16  output projection
    bp_ref  : (1, D)   f32   output bias
    o_ref   : (tq, D)        written only at the last kv step
    q_scr   : (tq, D)  bf16  scaled Q for all heads (computed at ki == 0)
    m_scr   : (tq, H)  f32   running per-head row max
    l_scr   : (tq, D)  f32   running per-head row sum (broadcast across head columns)
    acc_scr : (tq, D)  f32   running per-head context accumulator (head h -> cols h*hd:(h+1)*hd)
    """
    D = num_heads * head_dim
    ki = pl.program_id(2)

    @pl.when(ki == 0)
    def _init():
        # Q projection once per q-tile (wide matmul, scale folded into q).
        q = jnp.dot(xq_ref[...], wq_ref[...], preferred_element_type=jnp.float32)
        q_scr[...] = (q * scale).astype(jnp.bfloat16)
        m_scr[...] = jnp.full_like(m_scr, -jnp.inf)
        l_scr[...] = jnp.zeros_like(l_scr)
        acc_scr[...] = jnp.zeros_like(acc_scr)

    # K|V projection for this kv tile: one wide (tk, D) @ (D, 2D) matmul instead of
    # 2*H skinny (D, head_dim) ones.
    kv = jnp.dot(xkv_ref[...], wkv_ref[...],
                 preferred_element_type=jnp.float32).astype(jnp.bfloat16)   # (tk, 2D)

    # Online softmax; heads statically unrolled (H is small).
    for h in range(num_heads):
        sl = slice(h * head_dim, (h + 1) * head_dim)
        qh = q_scr[:, sl]                                  # (tq, hd) bf16, pre-scaled
        kh = kv[:, sl]                                     # (tk, hd) bf16
        vh = kv[:, D + h * head_dim: D + (h + 1) * head_dim]   # (tk, hd) bf16

        # q @ k^T for this head (contract last dims), f32 accumulation on the MXU.
        s = jax.lax.dot_general(qh, kh, (((1,), (1,)), ((), ())),
                                preferred_element_type=jnp.float32)         # (tq, tk)

        m_prev = m_scr[:, h:h + 1]                                          # (tq, 1)
        m_new = jnp.maximum(m_prev, jnp.max(s, axis=-1, keepdims=True))
        alpha = jnp.exp(m_prev - m_new)                                     # (tq, 1)
        p = jnp.exp(s - m_new)                                              # (tq, tk) f32

        l_scr[:, sl] = alpha * l_scr[:, sl] + jnp.sum(p, axis=-1, keepdims=True)
        acc_scr[:, sl] = alpha * acc_scr[:, sl] + jnp.dot(
            p.astype(jnp.bfloat16), vh, preferred_element_type=jnp.float32)
        m_scr[:, h:h + 1] = m_new

    # Finalize: normalize once, then the lane-dense output projection + bias (f32).
    @pl.when(ki == pl.num_programs(2) - 1)
    def _finalize():
        ctx = (acc_scr[...] * pl.reciprocal(l_scr[...], approx=False)
               ).astype(jnp.bfloat16)                                       # (tq, D)
        y = jnp.dot(ctx, wp_ref[...],
                    preferred_element_type=jnp.float32) + bp_ref[...]
        o_ref[...] = y.astype(o_ref.dtype)


def attention_forward(x, w_qkv, w_proj, b_proj, *, num_heads,
                      q_tile=None, kv_tile=None):
    B, N, D = x.shape
    head_dim = D // num_heads
    assert head_dim * num_heads == D
    scale = float(head_dim) ** -0.5

    # Tile sizes: full sequence at small N; capped for long sequences.
    # (Re-derive per generation — see TODO at top of file.)
    tq = q_tile if q_tile is not None else min(N, 128)
    tk = kv_tile if kv_tile is not None else min(N, 256)
    assert N % tq == 0 and N % tk == 0, "sequence length must be tileable"
    n_q, n_kv = N // tq, N // tk

    # ---- wrapper-side layout prep (XLA-level, free relative to the kernel) ----
    xb = x.astype(jnp.bfloat16)
    wq = w_qkv[:, :D].astype(jnp.bfloat16)          # (D, D)   Q columns of fused weight
    wkv = w_qkv[:, D:].astype(jnp.bfloat16)         # (D, 2D)  [K | V] columns
    wp = w_proj.astype(jnp.bfloat16)                # (D, D)
    bp = b_proj.reshape(1, D).astype(jnp.float32)   # (1, D)

    kernel = functools.partial(flash_mhsa_kernel, num_heads=num_heads,
                               head_dim=head_dim, scale=scale)

    out = pl.pallas_call(
        kernel,
        out_shape=jax.ShapeDtypeStruct((B, N, D), x.dtype),
        grid_spec=pltpu.PrefetchScalarGridSpec(
            num_scalar_prefetch=0,
            # batch and q-tile are independent ("parallel"); kv is the reduction
            # axis and therefore last + "arbitrary".
            grid=(B, n_q, n_kv),
            in_specs=[
                # x as query rows: block index independent of ki -> fetched once per q-tile.
                pl.BlockSpec((None, tq, D), lambda b, qi, ki: (b, qi, 0)),
                # x as key/value rows: walks the kv axis -> double-buffered by the pipeline.
                pl.BlockSpec((None, tk, D), lambda b, qi, ki: (b, ki, 0)),
                # Weights: constant index maps -> DMA'd once, reused for the whole grid.
                pl.BlockSpec((D, D), lambda b, qi, ki: (0, 0)),        # Wq
                pl.BlockSpec((D, 2 * D), lambda b, qi, ki: (0, 0)),    # Wkv
                pl.BlockSpec((D, D), lambda b, qi, ki: (0, 0)),        # Wproj
                pl.BlockSpec((1, D), lambda b, qi, ki: (0, 0)),        # bias
            ],
            out_specs=pl.BlockSpec((None, tq, D), lambda b, qi, ki: (b, qi, 0)),
            scratch_shapes=[
                pltpu.VMEM((tq, D), jnp.bfloat16),          # q_scr (scaled Q)
                pltpu.VMEM((tq, num_heads), jnp.float32),   # m (running max per head)
                pltpu.VMEM((tq, D), jnp.float32),           # l (running sum, head-bcast)
                pltpu.VMEM((tq, D), jnp.float32),           # acc (per-head context)
            ],
        ),
        compiler_params=pltpu.CompilerParams(
            dimension_semantics=("parallel", "parallel", "arbitrary"),
            # Explicit scoped-VMEM budget (conservative for v7x's 64 MiB physical).
            vmem_limit_bytes=32 * 1024 * 1024,
        ),
    )(xb, xb, wq, wkv, wp, bp)
    return out


def attention_reference(x, w_qkv, w_proj, b_proj, *, num_heads):
    """Pure-JAX f32 reference matching the PyTorch forward exactly."""
    B, N, D = x.shape
    head_dim = D // num_heads
    scale = float(head_dim) ** -0.5
    qkv = x @ w_qkv                                       # (B, N, 3D)
    q, k, v = jnp.split(qkv, 3, axis=-1)

    def to_heads(t):
        return t.reshape(B, N, num_heads, head_dim).transpose(0, 2, 1, 3)

    q, k, v = map(to_heads, (q, k, v))                    # (B, H, N, hd)
    a = jnp.einsum("bhnd,bhmd->bhnm", q, k) * scale
    a = jax.nn.softmax(a, axis=-1)
    out = jnp.einsum("bhnm,bhmd->bhnd", a, v)
    out = out.transpose(0, 2, 1, 3).reshape(B, N, D)
    return out @ w_proj + b_proj


if __name__ == "__main__":
    # Module config: embed_dim=32, num_heads=4 (head_dim=8), qkv_bias=False.
    B, N, D, H = 2, 8, 32, 4

    key = jax.random.PRNGKey(0)
    kx, kqkv, kproj, kbias = jax.random.split(key, 4)

    x = jax.random.normal(kx, (B, N, D), dtype=jnp.float32)
    # Deterministic synthetic parameters (not a checkpoint load); (in, out) layout.
    w_qkv = jax.random.normal(kqkv, (D, 3 * D), dtype=jnp.float32) * (D ** -0.5)
    w_proj = jax.random.normal(kproj, (D, D), dtype=jnp.float32) * (D ** -0.5)
    b_proj = jax.random.normal(kbias, (1, D), dtype=jnp.float32) * 0.02

    out = attention_forward(x, w_qkv, w_proj, b_proj, num_heads=H)
    out = jax.block_until_ready(out)

    ref = attention_reference(x, w_qkv, w_proj, b_proj[0], num_heads=H)
    assert out.shape == (B, N, D)
    # bf16 MXU operands (f32 accumulation) => bf16-level tolerance.
    assert jnp.allclose(out, ref, atol=5e-2, rtol=5e-2), "mismatch vs reference"

    print("KERNEL_OK")
</pallas_src>

<mosaic_0001>
module attributes {stable_mosaic.version = 11 : i64} {
  func.func @flash_mhsa_kernel(%arg0: i32, %arg1: i32, %arg2: i32, %arg3: memref<1x8x32xbf16, #tpu.memory_space<vmem>>, %arg4: memref<1x8x32xbf16, #tpu.memory_space<vmem>>, %arg5: memref<32x32xbf16, #tpu.memory_space<vmem>>, %arg6: memref<32x64xbf16, #tpu.memory_space<vmem>>, %arg7: memref<32x32xbf16, #tpu.memory_space<vmem>>, %arg8: memref<1x32xf32, #tpu.memory_space<vmem>>, %arg9: memref<1x8x32xf32, #tpu.memory_space<vmem>>, %arg10: memref<8x32xbf16, #tpu.memory_space<vmem>>, %arg11: memref<8x4xf32, #tpu.memory_space<vmem>>, %arg12: memref<8x32xf32, #tpu.memory_space<vmem>>, %arg13: memref<8x32xf32, #tpu.memory_space<vmem>>) attributes {dimension_semantics = [#tpu.dimension_semantics<parallel>, #tpu.dimension_semantics<parallel>, #tpu.dimension_semantics<arbitrary>], iteration_bounds = array<i64: 2, 1, 1>, scalar_prefetch = 0 : i64, scratch_operands = 4 : i64, tpu.core_type = #tpu.core_type<tc>, window_params = [{transform_indices = @transform_0, window_bounds = array<i64: 1, 8, 32>}, {transform_indices = @transform_1, window_bounds = array<i64: 1, 8, 32>}, {pipeline_mode = #tpu.pipeline_mode<synchronous>, transform_indices = @transform_2, window_bounds = array<i64: 32, 32>}, {pipeline_mode = #tpu.pipeline_mode<synchronous>, transform_indices = @transform_3, window_bounds = array<i64: 32, 64>}, {pipeline_mode = #tpu.pipeline_mode<synchronous>, transform_indices = @transform_4, window_bounds = array<i64: 32, 32>}, {pipeline_mode = #tpu.pipeline_mode<synchronous>, transform_indices = @transform_5, window_bounds = array<i64: 1, 32>}, {transform_indices = @transform_6, window_bounds = array<i64: 1, 8, 32>}]} {
    %c0_i32 = arith.constant 0 : i32
    %0 = arith.cmpi eq, %arg2, %c0_i32 : i32
    %1 = arith.extui %0 : i1 to i32
    %c0_i32_0 = arith.constant 0 : i32
    %2 = arith.cmpi ne, %1, %c0_i32_0 : i32
    scf.if %2 {
      %c0_73 = arith.constant 0 : index
      %c0_74 = arith.constant 0 : index
      %c0_75 = arith.constant 0 : index
      %127 = vector.load %arg3[%c0_73, %c0_74, %c0_75] : memref<1x8x32xbf16, #tpu.memory_space<vmem>>, vector<1x8x32xbf16>
      %128 = vector.shape_cast %127 : vector<1x8x32xbf16> to vector<8x32xbf16>
      %c0_76 = arith.constant 0 : index
      %c0_77 = arith.constant 0 : index
      %129 = vector.load %arg5[%c0_76, %c0_77] : memref<32x32xbf16, #tpu.memory_space<vmem>>, vector<32x32xbf16>
      %cst_78 = arith.constant dense<0.000000e+00> : vector<8x32xf32>
      %130 = tpu.matmul %128, %129, %cst_78 {dimension_numbers = #tpu.dot_dimension_numbers<[1], [0], [0], [1], [0, 0, 1, 1], [], []>} : vector<8x32xbf16>, vector<32x32xbf16>, vector<8x32xf32> -> vector<8x32xf32>
      %cst_79 = arith.constant 0.353553385 : f32
      %131 = vector.broadcast %cst_79 : f32 to vector<8x32xf32>
      %132 = arith.mulf %130, %131 : vector<8x32xf32>
      %133 = arith.truncf %132 : vector<8x32xf32> to vector<8x32xbf16>
      %c0_80 = arith.constant 0 : index
      %c0_81 = arith.constant 0 : index
      %134 = vector.load %arg10[%c0_80, %c0_81] : memref<8x32xbf16, #tpu.memory_space<vmem>>, vector<8x32xbf16>
      tpu.vector_store %arg10[%c0_80, %c0_81], %133 {strides = array<i32>} : memref<8x32xbf16, #tpu.memory_space<vmem>>, vector<8x32xbf16>,
      %cst_82 = arith.constant 0xFF800000 : f32
      %135 = vector.broadcast %cst_82 : f32 to vector<8x4xf32>
      %c0_83 = arith.constant 0 : index
      %c0_84 = arith.constant 0 : index
      %136 = vector.load %arg11[%c0_83, %c0_84] : memref<8x4xf32, #tpu.memory_space<vmem>>, vector<8x4xf32>
      tpu.vector_store %arg11[%c0_83, %c0_84], %135 {strides = array<i32>} : memref<8x4xf32, #tpu.memory_space<vmem>>, vector<8x4xf32>,
      %cst_85 = arith.constant 0.000000e+00 : f32
      %137 = vector.broadcast %cst_85 : f32 to vector<8x32xf32>
      %c0_86 = arith.constant 0 : index
      %c0_87 = arith.constant 0 : index
      %138 = vector.load %arg12[%c0_86, %c0_87] : memref<8x32xf32, #tpu.memory_space<vmem>>, vector<8x32xf32>
      tpu.vector_store %arg12[%c0_86, %c0_87], %137 {strides = array<i32>} : memref<8x32xf32, #tpu.memory_space<vmem>>, vector<8x32xf32>,
      %cst_88 = arith.constant 0.000000e+00 : f32
      %139 = vector.broadcast %cst_88 : f32 to vector<8x32xf32>
      %c0_89 = arith.constant 0 : index
      %c0_90 = arith.constant 0 : index
      %140 = vector.load %arg13[%c0_89, %c0_90] : memref<8x32xf32, #tpu.memory_space<vmem>>, vector<8x32xf32>
      tpu.vector_store %arg13[%c0_89, %c0_90], %139 {strides = array<i32>} : memref<8x32xf32, #tpu.memory_space<vmem>>, vector<8x32xf32>,
    } else {
    }
    %c0 = arith.constant 0 : index
    %c0_1 = arith.constant 0 : index
    %c0_2 = arith.constant 0 : index
    %3 = vector.load %arg4[%c0, %c0_1, %c0_2] : memref<1x8x32xbf16, #tpu.memory_space<vmem>>, vector<1x8x32xbf16>
    %4 = vector.shape_cast %3 : vector<1x8x32xbf16> to vector<8x32xbf16>
    %c0_3 = arith.constant 0 : index
    %c0_4 = arith.constant 0 : index
    %5 = vector.load %arg6[%c0_3, %c0_4] : memref<32x64xbf16, #tpu.memory_space<vmem>>, vector<32x64xbf16>
    %cst = arith.constant dense<0.000000e+00> : vector<8x64xf32>
    %6 = tpu.matmul %4, %5, %cst {dimension_numbers = #tpu.dot_dimension_numbers<[1], [0], [0], [1], [0, 0, 1, 1], [], []>} : vector<8x32xbf16>, vector<32x64xbf16>, vector<8x64xf32> -> vector<8x64xf32>
    %7 = arith.truncf %6 : vector<8x64xf32> to vector<8x64xbf16>
    %c0_5 = arith.constant 0 : index
    %c0_6 = arith.constant 0 : index
    %8 = vector.load %arg10[%c0_5, %c0_6] : memref<8x32xbf16, #tpu.memory_space<vmem>>, vector<8x8xbf16>
    %9 = vector.extract_strided_slice %7 {offsets = [0, 0], sizes = [8, 8], strides = [1, 1]} : vector<8x64xbf16> to vector<8x8xbf16>
    %10 = vector.extract_strided_slice %7 {offsets = [0, 32], sizes = [8, 8], strides = [1, 1]} : vector<8x64xbf16> to vector<8x8xbf16>
    %cst_7 = arith.constant dense<0.000000e+00> : vector<8x8xf32>
    %11 = tpu.matmul %8, %9, %cst_7 {dimension_numbers = #tpu.dot_dimension_numbers<[1], [1], [0], [0], [0, 0, 1, 0], [], []>} : vector<8x8xbf16>, vector<8x8xbf16>, vector<8x8xf32> -> vector<8x8xf32>
    %c0_8 = arith.constant 0 : index
    %c0_9 = arith.constant 0 : index
    %12 = vector.load %arg11[%c0_8, %c0_9] : memref<8x4xf32, #tpu.memory_space<vmem>>, vector<8x1xf32>
    %cst_10 = arith.constant dense<0xFF800000> : vector<8xf32>
    %13 = vector.multi_reduction <maximumf>, %11, %cst_10 [1] : vector<8x8xf32> to vector<8xf32>
    %14 = vector.shape_cast %13 : vector<8xf32> to vector<8x1xf32>
    %15 = arith.maximumf %12, %14 : vector<8x1xf32>
    %16 = arith.subf %12, %15 : vector<8x1xf32>
    %17 = math.exp %16 : vector<8x1xf32>
    %18 = vector.broadcast %15 : vector<8x1xf32> to vector<8x8xf32>
    %19 = arith.subf %11, %18 : vector<8x8xf32>
    %20 = math.exp %19 : vector<8x8xf32>
    %c0_11 = arith.constant 0 : index
    %c0_12 = arith.constant 0 : index
    %21 = vector.load %arg12[%c0_11, %c0_12] : memref<8x32xf32, #tpu.memory_space<vmem>>, vector<8x8xf32>
    %22 = vector.broadcast %17 : vector<8x1xf32> to vector<8x8xf32>
    %23 = arith.mulf %22, %21 : vector<8x8xf32>
    %cst_13 = arith.constant dense<0.000000e+00> : vector<8xf32>
    %24 = vector.multi_reduction <add>, %20, %cst_13 [1] : vector<8x8xf32> to vector<8xf32>
    %25 = vector.shape_cast %24 : vector<8xf32> to vector<8x1xf32>
    %26 = vector.broadcast %25 : vector<8x1xf32> to vector<8x8xf32>
    %27 = arith.addf %23, %26 : vector<8x8xf32>
    %c0_14 = arith.constant 0 : index
    %c0_15 = arith.constant 0 : index
    %28 = vector.load %arg12[%c0_14, %c0_15] : memref<8x32xf32, #tpu.memory_space<vmem>>, vector<8x8xf32>
    tpu.vector_store %arg12[%c0_14, %c0_15], %27 {strides = array<i32>} : memref<8x32xf32, #tpu.memory_space<vmem>>, vector<8x8xf32>,
    %c0_16 = arith.constant 0 : index
    %c0_17 = arith.constant 0 : index
    %29 = vector.load %arg13[%c0_16, %c0_17] : memref<8x32xf32, #tpu.memory_space<vmem>>, vector<8x8xf32>
    %30 = vector.broadcast %17 : vector<8x1xf32> to vector<8x8xf32>
    %31 = arith.mulf %30, %29 : vector<8x8xf32>
    %32 = arith.truncf %20 : vector<8x8xf32> to vector<8x8xbf16>
    %cst_18 = arith.constant dense<0.000000e+00> : vector<8x8xf32>
    %33 = tpu.matmul %32, %10, %cst_18 {dimension_numbers = #tpu.dot_dimension_numbers<[1], [0], [0], [1], [0, 0, 1, 1], [], []>} : vector<8x8xbf16>, vector<8x8xbf16>, vector<8x8xf32> -> vector<8x8xf32>
    %34 = arith.addf %31, %33 : vector<8x8xf32>
    %c0_19 = arith.constant 0 : index
    %c0_20 = arith.constant 0 : index
    %35 = vector.load %arg13[%c0_19, %c0_20] : memref<8x32xf32, #tpu.memory_space<vmem>>, vector<8x8xf32>
    tpu.vector_store %arg13[%c0_19, %c0_20], %34 {strides = array<i32>} : memref<8x32xf32, #tpu.memory_space<vmem>>, vector<8x8xf32>,
    %c0_21 = arith.constant 0 : index
    %c0_22 = arith.constant 0 : index
    %36 = vector.load %arg11[%c0_21, %c0_22] : memref<8x4xf32, #tpu.memory_space<vmem>>, vector<8x1xf32>
    tpu.vector_store %arg11[%c0_21, %c0_22], %15 {strides = array<i32>} : memref<8x4xf32, #tpu.memory_space<vmem>>, vector<8x1xf32>,
    %c0_23 = arith.constant 0 : index
    %c8 = arith.constant 8 : index
    %37 = vector.load %arg10[%c0_23, %c8] : memref<8x32xbf16, #tpu.memory_space<vmem>>, vector<8x8xbf16>
    %38 = vector.extract_strided_slice %7 {offsets = [0, 8], sizes = [8, 8], strides = [1, 1]} : vector<8x64xbf16> to vector<8x8xbf16>
    %39 = vector.extract_strided_slice %7 {offsets = [0, 40], sizes = [8, 8], strides = [1, 1]} : vector<8x64xbf16> to vector<8x8xbf16>
    %cst_24 = arith.constant dense<0.000000e+00> : vector<8x8xf32>
    %40 = tpu.matmul %37, %38, %cst_24 {dimension_numbers = #tpu.dot_dimension_numbers<[1], [1], [0], [0], [0, 0, 1, 0], [], []>} : vector<8x8xbf16>, vector<8x8xbf16>, vector<8x8xf32> -> vector<8x8xf32>
    %c0_25 = arith.constant 0 : index
    %c1 = arith.constant 1 : index
    %41 = vector.load %arg11[%c0_25, %c1] : memref<8x4xf32, #tpu.memory_space<vmem>>, vector<8x1xf32>
    %cst_26 = arith.constant dense<0xFF800000> : vector<8xf32>
    %42 = vector.multi_reduction <maximumf>, %40, %cst_26 [1] : vector<8x8xf32> to vector<8xf32>
    %43 = vector.shape_cast %42 : vector<8xf32> to vector<8x1xf32>
    %44 = arith.maximumf %41, %43 : vector<8x1xf32>
    %45 = arith.subf %41, %44 : vector<8x1xf32>
    %46 = math.exp %45 : vector<8x1xf32>
    %47 = vector.broadcast %44 : vector<8x1xf32> to vector<8x8xf32>
    %48 = arith.subf %40, %47 : vector<8x8xf32>
    %49 = math.exp %48 : vector<8x8xf32>
    %c0_27 = arith.constant 0 : index
    %c8_28 = arith.constant 8 : index
    %50 = vector.load %arg12[%c0_27, %c8_28] : memref<8x32xf32, #tpu.memory_space<vmem>>, vector<8x8xf32>
    %51 = vector.broadcast %46 : vector<8x1xf32> to vector<8x8xf32>
    %52 = arith.mulf %51, %50 : vector<8x8xf32>
    %cst_29 = arith.constant dense<0.000000e+00> : vector<8xf32>
    %53 = vector.multi_reduction <add>, %49, %cst_29 [1] : vector<8x8xf32> to vector<8xf32>
    %54 = vector.shape_cast %53 : vector<8xf32> to vector<8x1xf32>
    %55 = vector.broadcast %54 : vector<8x1xf32> to vector<8x8xf32>
    %56 = arith.addf %52, %55 : vector<8x8xf32>
    %c0_30 = arith.constant 0 : index
    %c8_31 = arith.constant 8 : index
    %57 = vector.load %arg12[%c0_30, %c8_31] : memref<8x32xf32, #tpu.memory_space<vmem>>, vector<8x8xf32>
    tpu.vector_store %arg12[%c0_30, %c8_31], %56 {strides = array<i32>} : memref<8x32xf32, #tpu.memory_space<vmem>>, vector<8x8xf32>,
    %c0_32 = arith.constant 0 : index
    %c8_33 = arith.constant 8 : index
    %58 = vector.load %arg13[%c0_32, %c8_33] : memref<8x32xf32, #tpu.memory_space<vmem>>, vector<8x8xf32>
    %59 = vector.broadcast %46 : vector<8x1xf32> to vector<8x8xf32>
    %60 = arith.mulf %59, %58 : vector<8x8xf32>
    %61 = arith.truncf %49 : vector<8x8xf32> to vector<8x8xbf16>
    %cst_34 = arith.constant dense<0.000000e+00> : vector<8x8xf32>
    %62 = tpu.matmul %61, %39, %cst_34 {dimension_numbers = #tpu.dot_dimension_numbers<[1], [0], [0], [1], [0, 0, 1, 1], [], []>} : vector<8x8xbf16>, vector<8x8xbf16>, vector<8x8xf32> -> vector<8x8xf32>
    %63 = arith.addf %60, %62 : vector<8x8xf32>
    %c0_35 = arith.constant 0 : index
    %c8_36 = arith.constant 8 : index
    %64 = vector.load %arg13[%c0_35, %c8_36] : memref<8x32xf32, #tpu.memory_space<vmem>>, vector<8x8xf32>
    tpu.vector_store %arg13[%c0_35, %c8_36], %63 {strides = array<i32>} : memref<8x32xf32, #tpu.memory_space<vmem>>, vector<8x8xf32>,
    %c0_37 = arith.constant 0 : index
    %c1_38 = arith.constant 1 : index
    %65 = vector.load %arg11[%c0_37, %c1_38] : memref<8x4xf32, #tpu.memory_space<vmem>>, vector<8x1xf32>
    tpu.vector_store %arg11[%c0_37, %c1_38], %44 {strides = array<i32>} : memref<8x4xf32, #tpu.memory_space<vmem>>, vector<8x1xf32>,
    %c0_39 = arith.constant 0 : index
    %c16 = arith.constant 16 : index
    %66 = vector.load %arg10[%c0_39, %c16] : memref<8x32xbf16, #tpu.memory_space<vmem>>, vector<8x8xbf16>
    %67 = vector.extract_strided_slice %7 {offsets = [0, 16], sizes = [8, 8], strides = [1, 1]} : vector<8x64xbf16> to vector<8x8xbf16>
    %68 = vector.extract_strided_slice %7 {offsets = [0, 48], sizes = [8, 8], strides = [1, 1]} : vector<8x64xbf16> to vector<8x8xbf16>
    %cst_40 = arith.constant dense<0.000000e+00> : vector<8x8xf32>
    %69 = tpu.matmul %66, %67, %cst_40 {dimension_numbers = #tpu.dot_dimension_numbers<[1], [1], [0], [0], [0, 0, 1, 0], [], []>} : vector<8x8xbf16>, vector<8x8xbf16>, vector<8x8xf32> -> vector<8x8xf32>
    %c0_41 = arith.constant 0 : index
    %c2 = arith.constant 2 : index
    %70 = vector.load %arg11[%c0_41, %c2] : memref<8x4xf32, #tpu.memory_space<vmem>>, vector<8x1xf32>
    %cst_42 = arith.constant dense<0xFF800000> : vector<8xf32>
    %71 = vector.multi_reduction <maximumf>, %69, %cst_42 [1] : vector<8x8xf32> to vector<8xf32>
    %72 = vector.shape_cast %71 : vector<8xf32> to vector<8x1xf32>
    %73 = arith.maximumf %70, %72 : vector<8x1xf32>
    %74 = arith.subf %70, %73 : vector<8x1xf32>
    %75 = math.exp %74 : vector<8x1xf32>
    %76 = vector.broadcast %73 : vector<8x1xf32> to vector<8x8xf32>
    %77 = arith.subf %69, %76 : vector<8x8xf32>
    %78 = math.exp %77 : vector<8x8xf32>
    %c0_43 = arith.constant 0 : index
    %c16_44 = arith.constant 16 : index
    %79 = vector.load %arg12[%c0_43, %c16_44] : memref<8x32xf32, #tpu.memory_space<vmem>>, vector<8x8xf32>
    %80 = vector.broadcast %75 : vector<8x1xf32> to vector<8x8xf32>
    %81 = arith.mulf %80, %79 : vector<8x8xf32>
    %cst_45 = arith.constant dense<0.000000e+00> : vector<8xf32>
    %82 = vector.multi_reduction <add>, %78, %cst_45 [1] : vector<8x8xf32> to vector<8xf32>
    %83 = vector.shape_cast %82 : vector<8xf32> to vector<8x1xf32>
    %84 = vector.broadcast %83 : vector<8x1xf32> to vector<8x8xf32>
    %85 = arith.addf %81, %84 : vector<8x8xf32>
    %c0_46 = arith.constant 0 : index
    %c16_47 = arith.constant 16 : index
    %86 = vector.load %arg12[%c0_46, %c16_47] : memref<8x32xf32, #tpu.memory_space<vmem>>, vector<8x8xf32>
    tpu.vector_store %arg12[%c0_46, %c16_47], %85 {strides = array<i32>} : memref<8x32xf32, #tpu.memory_space<vmem>>, vector<8x8xf32>,
    %c0_48 = arith.constant 0 : index
    %c16_49 = arith.constant 16 : index
    %87 = vector.load %arg13[%c0_48, %c16_49] : memref<8x32xf32, #tpu.memory_space<vmem>>, vector<8x8xf32>
    %88 = vector.broadcast %75 : vector<8x1xf32> to vector<8x8xf32>
    %89 = arith.mulf %88, %87 : vector<8x8xf32>
    %90 = arith.truncf %78 : vector<8x8xf32> to vector<8x8xbf16>
    %cst_50 = arith.constant dense<0.000000e+00> : vector<8x8xf32>
    %91 = tpu.matmul %90, %68, %cst_50 {dimension_numbers = #tpu.dot_dimension_numbers<[1], [0], [0], [1], [0, 0, 1, 1], [], []>} : vector<8x8xbf16>, vector<8x8xbf16>, vector<8x8xf32> -> vector<8x8xf32>
    %92 = arith.addf %89, %91 : vector<8x8xf32>
    %c0_51 = arith.constant 0 : index
    %c16_52 = arith.constant 16 : index
    %93 = vector.load %arg13[%c0_51, %c16_52] : memref<8x32xf32, #tpu.memory_space<vmem>>, vector<8x8xf32>
    tpu.vector_store %arg13[%c0_51, %c16_52], %92 {strides = array<i32>} : memref<8x32xf32, #tpu.memory_space<vmem>>, vector<8x8xf32>,
    %c0_53 = arith.constant 0 : index
    %c2_54 = arith.constant 2 : index
    %94 = vector.load %arg11[%c0_53, %c2_54] : memref<8x4xf32, #tpu.memory_space<vmem>>, vector<8x1xf32>
    tpu.vector_store %arg11[%c0_53, %c2_54], %73 {strides = array<i32>} : memref<8x4xf32, #tpu.memory_space<vmem>>, vector<8x1xf32>,
    %c0_55 = arith.constant 0 : index
    %c24 = arith.constant 24 : index
    %95 = vector.load %arg10[%c0_55, %c24] : memref<8x32xbf16, #tpu.memory_space<vmem>>, vector<8x8xbf16>
    %96 = vector.extract_strided_slice %7 {offsets = [0, 24], sizes = [8, 8], strides = [1, 1]} : vector<8x64xbf16> to vector<8x8xbf16>
    %97 = vector.extract_strided_slice %7 {offsets = [0, 56], sizes = [8, 8], strides = [1, 1]} : vector<8x64xbf16> to vector<8x8xbf16>
    %cst_56 = arith.constant dense<0.000000e+00> : vector<8x8xf32>
    %98 = tpu.matmul %95, %96, %cst_56 {dimension_numbers = #tpu.dot_dimension_numbers<[1], [1], [0], [0], [0, 0, 1, 0], [], []>} : vector<8x8xbf16>, vector<8x8xbf16>, vector<8x8xf32> -> vector<8x8xf32>
    %c0_57 = arith.constant 0 : index
    %c3 = arith.constant 3 : index
    %99 = vector.load %arg11[%c0_57, %c3] : memref<8x4xf32, #tpu.memory_space<vmem>>, vector<8x1xf32>
    %cst_58 = arith.constant dense<0xFF800000> : vector<8xf32>
    %100 = vector.multi_reduction <maximumf>, %98, %cst_58 [1] : vector<8x8xf32> to vector<8xf32>
    %101 = vector.shape_cast %100 : vector<8xf32> to vector<8x1xf32>
    %102 = arith.maximumf %99, %101 : vector<8x1xf32>
    %103 = arith.subf %99, %102 : vector<8x1xf32>
    %104 = math.exp %103 : vector<8x1xf32>
    %105 = vector.broadcast %102 : vector<8x1xf32> to vector<8x8xf32>
    %106 = arith.subf %98, %105 : vector<8x8xf32>
    %107 = math.exp %106 : vector<8x8xf32>
    %c0_59 = arith.constant 0 : index
    %c24_60 = arith.constant 24 : index
    %108 = vector.load %arg12[%c0_59, %c24_60] : memref<8x32xf32, #tpu.memory_space<vmem>>, vector<8x8xf32>
    %109 = vector.broadcast %104 : vector<8x1xf32> to vector<8x8xf32>
    %110 = arith.mulf %109, %108 : vector<8x8xf32>
    %cst_61 = arith.constant dense<0.000000e+00> : vector<8xf32>
    %111 = vector.multi_reduction <add>, %107, %cst_61 [1] : vector<8x8xf32> to vector<8xf32>
    %112 = vector.shape_cast %111 : vector<8xf32> to vector<8x1xf32>
    %113 = vector.broadcast %112 : vector<8x1xf32> to vector<8x8xf32>
    %114 = arith.addf %110, %113 : vector<8x8xf32>
    %c0_62 = arith.constant 0 : index
    %c24_63 = arith.constant 24 : index
    %115 = vector.load %arg12[%c0_62, %c24_63] : memref<8x32xf32, #tpu.memory_space<vmem>>, vector<8x8xf32>
    tpu.vector_store %arg12[%c0_62, %c24_63], %114 {strides = array<i32>} : memref<8x32xf32, #tpu.memory_space<vmem>>, vector<8x8xf32>,
    %c0_64 = arith.constant 0 : index
    %c24_65 = arith.constant 24 : index
    %116 = vector.load %arg13[%c0_64, %c24_65] : memref<8x32xf32, #tpu.memory_space<vmem>>, vector<8x8xf32>
    %117 = vector.broadcast %104 : vector<8x1xf32> to vector<8x8xf32>
    %118 = arith.mulf %117, %116 : vector<8x8xf32>
    %119 = arith.truncf %107 : vector<8x8xf32> to vector<8x8xbf16>
    %cst_66 = arith.constant dense<0.000000e+00> : vector<8x8xf32>
    %120 = tpu.matmul %119, %97, %cst_66 {dimension_numbers = #tpu.dot_dimension_numbers<[1], [0], [0], [1], [0, 0, 1, 1], [], []>} : vector<8x8xbf16>, vector<8x8xbf16>, vector<8x8xf32> -> vector<8x8xf32>
    %121 = arith.addf %118, %120 : vector<8x8xf32>
    %c0_67 = arith.constant 0 : index
    %c24_68 = arith.constant 24 : index
    %122 = vector.load %arg13[%c0_67, %c24_68] : memref<8x32xf32, #tpu.memory_space<vmem>>, vector<8x8xf32>
    tpu.vector_store %arg13[%c0_67, %c24_68], %121 {strides = array<i32>} : memref<8x32xf32, #tpu.memory_space<vmem>>, vector<8x8xf32>,
    %c0_69 = arith.constant 0 : index
    %c3_70 = arith.constant 3 : index
    %123 = vector.load %arg11[%c0_69, %c3_70] : memref<8x4xf32, #tpu.memory_space<vmem>>, vector<8x1xf32>
    tpu.vector_store %arg11[%c0_69, %c3_70], %102 {strides = array<i32>} : memref<8x4xf32, #tpu.memory_space<vmem>>, vector<8x1xf32>,
    %c0_i32_71 = arith.constant 0 : i32
    %124 = arith.cmpi eq, %arg2, %c0_i32_71 : i32
    %125 = arith.extui %124 : i1 to i32
    %c0_i32_72 = arith.constant 0 : i32
    %126 = arith.cmpi ne, %125, %c0_i32_72 : i32
    scf.if %126 {
      %c0_73 = arith.constant 0 : index
      %c0_74 = arith.constant 0 : index
      %127 = vector.load %arg13[%c0_73, %c0_74] : memref<8x32xf32, #tpu.memory_space<vmem>>, vector<8x32xf32>
      %c0_75 = arith.constant 0 : index
      %c0_76 = arith.constant 0 : index
      %128 = vector.load %arg12[%c0_75, %c0_76] : memref<8x32xf32, #tpu.memory_space<vmem>>, vector<8x32xf32>
      %129 = tpu.reciprocal %128 : vector<8x32xf32> -> vector<8x32xf32>
      %130 = arith.mulf %127, %129 : vector<8x32xf32>
      %131 = arith.truncf %130 : vector<8x32xf32> to vector<8x32xbf16>
      %c0_77 = arith.constant 0 : index
      %c0_78 = arith.constant 0 : index
      %132 = vector.load %arg7[%c0_77, %c0_78] : memref<32x32xbf16, #tpu.memory_space<vmem>>, vector<32x32xbf16>
      %cst_79 = arith.constant dense<0.000000e+00> : vector<8x32xf32>
      %133 = tpu.matmul %131, %132, %cst_79 {dimension_numbers = #tpu.dot_dimension_numbers<[1], [0], [0], [1], [0, 0, 1, 1], [], []>} : vector<8x32xbf16>, vector<32x32xbf16>, vector<8x32xf32> -> vector<8x32xf32>
      %c0_80 = arith.constant 0 : index
      %c0_81 = arith.constant 0 : index
      %134 = vector.load %arg8[%c0_80, %c0_81] : memref<1x32xf32, #tpu.memory_space<vmem>>, vector<1x32xf32>
      %135 = vector.broadcast %134 : vector<1x32xf32> to vector<8x32xf32>
      %136 = arith.addf %133, %135 : vector<8x32xf32>
      %c0_82 = arith.constant 0 : index
      %c0_83 = arith.constant 0 : index
      %c0_84 = arith.constant 0 : index
      %137 = vector.load %arg9[%c0_82, %c0_83, %c0_84] : memref<1x8x32xf32, #tpu.memory_space<vmem>>, vector<1x8x32xf32>
      %138 = vector.shape_cast %137 : vector<1x8x32xf32> to vector<8x32xf32>
      %139 = vector.shape_cast %136 : vector<8x32xf32> to vector<1x8x32xf32>
      tpu.vector_store %arg9[%c0_82, %c0_83, %c0_84], %139 {strides = array<i32>} : memref<1x8x32xf32, #tpu.memory_space<vmem>>, vector<1x8x32xf32>,
    } else {
    }
    return
  }
  func.func @transform_0(%arg0: i32, %arg1: i32, %arg2: i32) -> (i32, i32, i32) {
    %c0_i32 = arith.constant 0 : i32
    %c0_i32_0 = arith.constant 0 : i32
    return %arg0, %arg1, %c0_i32 : i32, i32, i32
  }
  func.func @transform_1(%arg0: i32, %arg1: i32, %arg2: i32) -> (i32, i32, i32) {
    %c0_i32 = arith.constant 0 : i32
    %c0_i32_0 = arith.constant 0 : i32
    return %arg0, %arg2, %c0_i32 : i32, i32, i32
  }
  func.func @transform_2(%arg0: i32, %arg1: i32, %arg2: i32) -> (i32, i32) {
    %c0_i32 = arith.constant 0 : i32
    %c0_i32_0 = arith.constant 0 : i32
    %c0_i32_1 = arith.constant 0 : i32
    return %c0_i32, %c0_i32_0 : i32, i32
  }
  func.func @transform_3(%arg0: i32, %arg1: i32, %arg2: i32) -> (i32, i32) {
    %c0_i32 = arith.constant 0 : i32
    %c0_i32_0 = arith.constant 0 : i32
    %c0_i32_1 = arith.constant 0 : i32
    return %c0_i32, %c0_i32_0 : i32, i32
  }
  func.func @transform_4(%arg0: i32, %arg1: i32, %arg2: i32) -> (i32, i32) {
    %c0_i32 = arith.constant 0 : i32
    %c0_i32_0 = arith.constant 0 : i32
    %c0_i32_1 = arith.constant 0 : i32
    return %c0_i32, %c0_i32_0 : i32, i32
  }
  func.func @transform_5(%arg0: i32, %arg1: i32, %arg2: i32) -> (i32, i32) {
    %c0_i32 = arith.constant 0 : i32
    %c0_i32_0 = arith.constant 0 : i32
    %c0_i32_1 = arith.constant 0 : i32
    return %c0_i32, %c0_i32_0 : i32, i32
  }
  func.func @transform_6(%arg0: i32, %arg1: i32, %arg2: i32) -> (i32, i32, i32) {
    %c0_i32 = arith.constant 0 : i32
    %c0_i32_0 = arith.constant 0 : i32
    return %arg0, %arg1, %c0_i32 : i32, i32, i32
  }
}

</mosaic_0001>

<bundles_post_ra>
// kernel: tpu_custom_call.1
= control target key start
LH: loop header
LB: loop body
LE: loop exit
PB: predicated region body
PF: predicated region fallthrough
CT: control target
= control target key end

     0   :  { %s1782_s0 = inlined_call_operand.hbm [shape: bf16[2,8,32], index: 0, kind: input, shape index: {}]   ;;  %s1783_s1 = inlined_call_operand.hbm [shape: bf16[2,8,32], index: 1, kind: input, shape index: {}]   ;;  %s1784_s2 = inlined_call_operand.hbm [shape: bf16[32,32], index: 2, kind: input, shape index: {}]   ;;  %s1785_s3 = inlined_call_operand.hbm [shape: bf16[32,64], index: 3, kind: input, shape index: {}]   ;;  %s1786_s4 = inlined_call_operand.hbm [shape: bf16[32,32], index: 4, kind: input, shape index: {}]   ;;  %s1787_s5 = inlined_call_operand.vmem [shape: f32[1,32], index: 5, kind: input, shape index: {}]   ;;  %s1788_s6 = inlined_call_operand.hbm [shape: f32[2,8,32], index: 6, kind: output, shape index: {}]  }
   0x1   :  { %1792 = sst [smem:[#allocation25_spill]] %s1784_s2 }
   0x2   :  { %1793 = sst [smem:[#allocation26_spill]] %s1785_s3 }
   0x3   :  { %1794 = sst [smem:[#allocation27_spill]] %s1786_s4 }
   0x4   :  { %11 = vsyncpa [#allocation7], 0 }
   0x5   :  { %13 = vsyncpa [#allocation7 + $0x1], 0 }
   0x6   :  { %14 = vsyncpa [#allocation10], 0 }
   0x7   :  { %16 = vsyncpa [#allocation10 + $0x1], 0 }
   0x8   :  { %17 = vsyncpa [#allocation13], 0 }
   0x9   :  { %18 = vsyncpa [#allocation8], 0 }
   0xa   :  { %20 = vsyncpa [#allocation8 + $0x1], 0  ;;  %s1530_s21 = smov 0   ;;  %s1532_s22 = smov 0  }
   0xb   :  { %s1534_s23 = smov 0   ;;  %s1536_s24 = smov 0  }
   0xc   :  { %s1538_s25 = smov 0   ;;  %s1540_s26 = smov 0  }
   0xd LB: > { %1795 = sst [smem:[#allocation21_spill]] %s1460_s23  ;;  %s1561_s27 = sadd.s32 4294967295, %s1472_s26   ;;  %s1472_s26 = sphi %s1540_s26, %s26_s26   ;;  %s1468_s25 = sphi %s1538_s25, %s1811_s25   ;;  %s1464_s24 = sphi %s1536_s24, %s1810_s24   ;;  %s1460_s23 = sphi %s1534_s23, %s1809_s23   ;;  %s1456_s22 = sphi %s1532_s22, %s1813_s22   ;;  %s1452_s21 = sphi %s1530_s21, %s1812_s21  }
   0xe   : > { %1796 = sst [smem:[#allocation22_spill]] %s1468_s25  ;;  %p1023_p0 = scmp.ge.s32.totalorder %s1472_s26, 1 }
   0xf   : > { %p68_p1 = scmp.eq.s32.totalorder %s1561_s27, 0  ;;  %p218_p2 = scmp.lt.s32.totalorder %s1472_s26, 3 }
  0x10   : > { %s1797_s2 = sld [smem:[#allocation25_spill]]  ;;  %s1474_s8 = smov [#allocation11]  }
  0x11   : > { %p1569_p3 = pnand %p1023_p0, %p218_p2  ;;  %s231_s9 = sshll.u32 %s1474_s8, 4  ;;  %s232_s9 = int_to_ptr.vmem [resolvable:$true] %s231_s9 }
  0x12   : > { %p1027_p6 = scmp.ge.s32.totalorder %s1472_s26, 2  ;;  %s1800_s3 = sld [smem:[#allocation26_spill]] }
  0x13   : > { %p1102_p4 = pneg %p1569_p3  ;;  %s1475_s14 = smov 64  }
  0x14   : > { %s1476_s15 = smov 4   ;;  %s1477_s16 = smov [#allocation12]  }
  0x15   : > { %p1577_p5 = pnand %p1102_p4, %p68_p1  ;;  %s245_s17 = sshll.u32 %s1477_s16, 4  ;;  %s246_s17 = int_to_ptr.vmem [resolvable:$true] %s245_s17 }
  0x16   : > { %s229_s30 = sshll.u32 %s1797_s2, 4  ;;  %s1801_s4 = sld [smem:[#allocation27_spill]]  ;;  %s230_s30 = int_to_ptr.hbm [resolvable:$true] %s229_s30 }
  0x17   : > { %1105 = dma.hbm_to_vmem [thread:$0]  (!%p1577_p5), %s230_s30, 256, %s232_s9, [#allocation10], %s1475_s14, %s1475_s14, %s1476_s15  }
  0x18   : > { %s243_s13 = sshll.u32 %s1800_s3, 4  ;;  %s1478_s28 = smov [#allocation14]   ;;  %s244_s13 = int_to_ptr.hbm [resolvable:$true] %s243_s13 }
  0x19   : > { %1108 = dma.hbm_to_vmem [thread:$0]  (!%p1577_p5), %s244_s13, 256, %s246_s17, [#allocation13], %s1475_s14, %s1475_s14, %s1476_s15  }
  0x1a   : > { %s259_s29 = sshll.u32 %s1478_s28, 4  ;;  %s1022_s30 = sadd.s32 4294967294, %s1472_s26   ;;  %s260_s29 = int_to_ptr.vmem [resolvable:$true] %s259_s29 }
  0x1b   : > { %s45_s8 = sadd.s32 1, %s1468_s25  ;;  %s54_s9 = sadd.s32 1, %s1460_s23 }
  0x1c   : > { %s257_s20 = sshll.u32 %s1801_s4, 4  ;;  %p47_p7 = scmp.ge.s32.totalorder %s45_s8, 2  ;;  %s258_s20 = int_to_ptr.hbm [resolvable:$true] %s257_s20 }
  0x1d   : > { %1111 = dma.hbm_to_vmem [thread:$0]  (!%p1577_p5), %s258_s20, 256, %s260_s29, [#allocation13], %s1475_s14, %s1475_s14, %s1476_s15  }
  0x1e   : > { %p61_p8 = scmp.ne.s32.totalorder %s1460_s23, %s1456_s22  ;;  %p62_p9 = scmp.eq.s32.totalorder %s1472_s26, 0 }
  0x1f   : > { %p67_p10 = scmp.ne.s32.totalorder %s1456_s22, %s1452_s21  ;;  %s1815_s8 = smov (%p47_p7, %s45_s8), 0 }
  0x20   : > { %1802 = sst [smem:[#allocation23_spill]] %s1815_s8  ;;  %p1604_p11 = por %p62_p9, %p61_p8 }
  0x21   : > { %p1610_p12 = por %p68_p1, %p67_p10  ;;  %s49_s12 = ssub.s32 %s1468_s25, %s1815_s8 }
  0x22   : > { %p205_p13 = scmp.eq.s32.totalorder %s1561_s27, 1  ;;  %p52_p0 = scmp.eq.s32.totalorder %s49_s12, 0 }
  0x23   : > { %p211_p2 = scmp.eq.s32.totalorder %s1022_s30, 1  ;;  %p1126_p5 = scmp.lt.s32.totalorder %s1472_s26, 2 }
  0x24   : > { %p1617_p4 = por %p205_p13, %p61_p8  ;;  %s276_s16 = sand.u32 1, %s1460_s23  }
  0x25   : > { %s1623_s14 = scalar_select %p52_p0, %s1460_s23, %s54_s9  }
  0x26   : > { %p1625_p7 = por %p211_p2, %p67_p10  ;;  %s1028_s17 = sshll.u32 %s276_s16, 2 }
  0x27   : > { %1806 = sst [smem:[#allocation24_spill]] %s1623_s14  ;;  %s1029_s18 = sshll.u32 %s1468_s25, 2 }
  0x28   : > { %s285_s28 = scalar_lea.hbm %s1782_s0, %s1029_s18  ;;  %s280_s29 = scalar_lea.vmem [#allocation6], %s1028_s17 }
  0x29   : > { %s289_s30 = sshll.u32 %s280_s29, 4  ;;  %s287_s12 = sshll.u32 %s285_s28, 4  ;;  %s290_s30 = int_to_ptr.vmem [resolvable:$true] %s289_s30  ;;  %s288_s12 = int_to_ptr.hbm [resolvable:$true] %s287_s12 }
  0x2a   : > { %p1113_p8 = pnand %p1126_p5, %p1604_p11  ;;  %s305_s3 = scalar_lea.hbm %s1783_s1, %s1029_s18 }
  0x2b   : > { %s296_s4 = sand.u32 1, %s1472_s26   ;;  %s277_s8 = scalar_lea.sflag [#allocation7], %s276_s16 }
  0x2c   : > { %1115 = dma.hbm_to_vmem [thread:$0]  (!%p1113_p8), %s288_s12, 64, %s290_s30, %s277_s8  }
  0x2d   : > { %s307_s14 = sshll.u32 %s305_s3, 4  ;;  %s300_s25 = scalar_lea.vmem [#allocation9], %s1028_s17  ;;  %s308_s14 = int_to_ptr.hbm [resolvable:$true] %s307_s14 }
  0x2e   : > { %s309_s23 = sshll.u32 %s300_s25, 4  ;;  %s297_s19 = scalar_lea.sflag [#allocation10], %s296_s4  ;;  %s310_s23 = int_to_ptr.vmem [resolvable:$true] %s309_s23 }
  0x2f   : > { %1118 = dma.hbm_to_vmem [thread:$0]  (!%p1113_p8), %s308_s14, 64, %s310_s23, %s297_s19  }
  0x30   : > { %318 = sbr.rel (%p1569_p3) target bundleno = 1406 (0x57e), region = 44  ;;  %s1643_s11 = sand.u32 (!%p1569_p3), 1, %s1456_s22  }
  0x31   : > { %s1033_s2 = sshll.u32 (!%p1569_p3), %s1643_s11, 2  ;;  %s321_s18 = scalar_lea.sflag (!%p1569_p3), [#allocation7], %s1643_s11 }
  0x32   : > { %s324_s16 = scalar_lea.vmem (!%p1569_p3), [#allocation6], %s1033_s2 }
  0x35   : > { %1431 = dma.done.wait (%p1610_p12), %s321_s18, 64  }
  0x36   : > { %1433 = vsyncadd (%p1610_p12), %s321_s18, 4294967232  ;;  %s330_s3 = sand.u32 1, %s1561_s27   ;;  %s334_s23 = scalar_lea.vmem [#allocation9], %s1033_s2 }
  0x37   : > { %s331_s4 = scalar_lea.sflag [#allocation10], %s330_s3 }
  0x38   : > { %1435 = dma.done.wait (%p1610_p12), %s331_s4, 64  }
  0x39   : > { %1437 = vsyncadd (%p1610_p12), %s331_s4, 4294967232 }
  0x3a   : > { %1439 = dma.done.wait (%p68_p1), [#allocation10], 256  }
  0x3b   : > { %1441 = vsyncadd (%p68_p1), [#allocation10], 4294967040 }
  0x3c   : > { %1443 = dma.done.wait (%p68_p1), [#allocation13], 512  }
  0x3d   : > { %1445 = vsyncadd (%p68_p1), [#allocation13], 4294966784  ;;  %vm406_vm0 = vcmask 261120   ;;  %v1479_v0 = vmov 0.0   ;;  %v1079_v1 = vld [vmem:[#allocation11 + $0x8] sm:$0xff]  ;;  %v1081_v2 = vld [vmem:[#allocation12 + $0x8] sm:$0xff] }
  0x3e   : > { %429 = vst.msk [vmem:[#allocation4] sm:$0xff] %vm406_vm0, %v1479_v0  ;;  %416 = vmatpush.bf16.msra.mxu0 %v1079_v1  ;;  %458 = vmatpush.bf16.msra.mxu1 %v1081_v2  ;;  %v1078_v3 = vld [vmem:[#allocation11] sm:$0xff]  ;;  %v1080_v4 = vld [vmem:[#allocation12] sm:$0xff]  ;;  %v431_v6 = vld [vmem:[%s334_s23] sm:$0xf]  ;;  %vm467_vm1 = vcmask 64512  }
  0x3f   : > { %430 = vst.msk [vmem:[#allocation5] sm:$0xff] %vm406_vm0, %v1479_v0  ;;  %v389_v5 = vld [vmem:[%s324_s16] sm:$0xf]  ;;  %vm425_vm2 = vcmask 257024   ;;  %s1480_s25 = smov 96   ;;  %s1481_s27 = smov 120  }
  0x40   : > { %s1482_s7 = smov 112   ;;  %s1483_s8 = smov 104   ;;  %vm526_vm3 = vcmask 1043456   ;;  %vm427_vm4 = vcmask 31744   ;;  %v1484_v31 = vmov -inf   ;;  %v1485_v39 = vmov 0  }
  0x41   : > { %428 = vst.msk [vmem:[#allocation3] sm:$0xff] %vm427_vm4, %v1484_v31  ;;  %1200 = vset.pattern.permute.xlu0 %v1485_v39  ;;  %vm545_vm5 = vcmask 7168   ;;  %s1486_s10 = smov 80   ;;  %v1487_v63 = vmov 1   ;;  %v1488_v0 = vmov 2   ;;  %vm633_vm6 = vcmask 15368  }
  0x42   : > { %417 = vmatpush.bf16.msra.mxu0 %v1078_v3  ;;  %459 = vmatpush.bf16.msra.mxu1 %v1080_v4  ;;  %vm721_vm7 = vcmask 23568   ;;  %s1489_s14 = smov 88   ;;  %vm809_vm8 = vcmask 31768   ;;  %s1491_s17 = smov 72   ;;  %vm601_vm9 = vcmask 130112   ;;  %vm689_vm10 = vcmask 195712  }
  0x43   : > { %1201 = vset.pattern.permute.xlu2 %v1487_v63  ;;  %1202 = vset.pattern.permute.xlu1 %v1488_v0  ;;  %s1492_s20 = smov 8   ;;  %s1493_s28 = smov 24   ;;  %vm777_vm11 = vcmask 261312  }
  0x44   : > { %s1494_s29 = smov 16   ;;  %s1075_s30 = sshll.u32 %s1464_s24, 3 }
  0x45   : > { %1047 = vmatmul.msk.bf16.vlgmr.msra.gmra.mxu0 %vm406_vm0, %v389_v5  ;;  %1056 = vmatmul.msk.bf16.vlgmr.msra.gmra.mxu1 %vm406_vm0, %v431_v6  ;;  %s1038_s12 = sshll.u32 %s1643_s11, 3  ;;  %s881_s2 = scalar_lea.hbm %s1788_s6, %s1075_s30 }
  0x46   : > { %s383_s3 = scalar_lea.vmem [#allocation15], %s1038_s12  ;;  %s885_s23 = sshll.u32 %s881_s2, 4  ;;  %s886_s23 = int_to_ptr.hbm [resolvable:$true] %s885_s23 }
  0x47   : > { %s883_s4 = sshll.u32 %s383_s3, 4  ;;  %s870_s24 = scalar_lea.sflag [#allocation8], %s1643_s11  ;;  %s884_s4 = int_to_ptr.vmem [resolvable:$true] %s883_s4 }
  0x48   : > { %v1682_v40 = vld [vmem:[#allocation3] sm:$0xff] }
  0xc2   : > { %v419_v7 = vpop.f32.mrf.mxu0  ;;  %v461_v8 = vpop.f32.mrf.mxu1 }
  0xc3   : > { %v423_v9 = vmul.f32 0.35355338, %v419_v7  ;;  %v465_v10 = vpack.c.bf16 %v461_v8, %v461_v8 }
  0xc5   : > { %v424_v11 = vpack.c.bf16 %v423_v9, %v423_v9  ;;  %v519_v12 = vunpack.c.l.b16 %v465_v10  ;;  %v472_v13 = vsel %vm467_vm1, %v465_v10, 0  ;;  %v1490_v9 = vmov 3  }
  0xc6   : > { %481 = vmatpush.bf16.xpose.msra.mxu2 %v472_v13 }
  0xc7   : > { %426 = vst.msk [vmem:[#allocation2] sm:$0xf] %vm425_vm2, %v424_v11  ;;  %v1669_v14 = vpack.c.b16 %v519_v12, %v519_v12 }
  0xc9   : > { %521 = vrot.lane.b32.xlu1 %v1669_v14, %s1480_s25  ;;  %s1392_s25 = sshra.s32 %s886_s23, 4  ;;  %s1393_s25 = int_to_ptr.hbm [resolvable:$true] %s1392_s25 }
  0xca   : > { %v421_v15 = vpop.f32.mrf.mxu0  ;;  %v463_v16 = vpop.f32.mrf.mxu1  ;;  %p1399_p10 = scmp.lt.s32.totalorder %s1393_s25, %s1788_s6 }
  0xce   : > { %v466_v17 = vld [vmem:[#allocation2] sm:$0xf] }
  0xcf   : > { %v547_v18 = vld [vmem:[#allocation2] sm:$0xf]  ;;  %1057 = vmatmul.msk.bf16.vlgmr.msra.gmra.mxu2 %vm467_vm1, %v466_v17 }
  0xd0   : > { %v549_v19 = vunpack.c.l.b16 %v547_v18  ;;  %v635_v20 = vld [vmem:[#allocation2] sm:$0xf] }
  0xd1   : > { %553 = vrot.lane.b32.xlu1 %v1669_v14, %s1481_s27  ;;  %v637_v22 = vunpack.c.l.b16 %v635_v20  ;;  %v723_v24 = vld [vmem:[#allocation2] sm:$0xf] }
  0xd2   : > { %v550_v21 = vpack.c.b16 %v549_v19, %v549_v19  ;;  %v725_v25 = vunpack.c.l.b16 %v723_v24 }
  0xd3   : > { %v638_v23 = vpack.c.b16 %v637_v22, %v637_v22 }
  0xd4   : > { %551 = vrot.lane.b32.xlu2 %v550_v21, %s1481_s27  ;;  %v726_v26 = vpack.c.b16 %v725_v25, %v725_v25  ;;  %s1394_s27 = scalar_lea.hbm %s1393_s25, 8 }
  0xd5   : > { %p1395_p1 = scmp.ne.s32.totalorder %s1393_s25, %s1394_s27 }
  0xd7   : > { %p1396_p3 = pnand %p1395_p1, %p1617_p4 }
  0xd9   : > { %639 = vrot.lane.b32.xlu1 %v638_v23, %s1482_s7  ;;  %p1397_p9 = pneg %p1396_p3 }
  0xdc   : > { %641 = vrot.lane.b32.xlu2 %v1669_v14, %s1482_s7 }
  0xe1   : > { %727 = vrot.lane.b32.xlu1 %v726_v26, %s1483_s8 }
  0xe4   : > { %729 = vrot.lane.b32.xlu2 %v1669_v14, %s1483_s8 }
 0x12e   : > { %v552_v27 = vpop.permute.xlu2 %551 }
 0x136   : > { %v642_v28 = vpop.permute.xlu2 %641 }
 0x137   : > { %v647_v29 = vsel %vm467_vm1, %v642_v28, 0 }
 0x138   : > { %656 = vmatpush.bf16.xpose.msrb.mxu1 %v647_v29 }
 0x13b   : > { %v522_v30 = vpop.permute.xlu1 %521 }
 0x13c   : > { %v528_v32 = vsel %vm526_vm3, %v522_v30, 0 }
 0x13d   : > { %537 = vmatpush.bf16.msra.mxu3 %v528_v32 }
 0x13e   : > { %v730_v51 = vpop.permute.xlu2 %729 }
 0x13f   : > { %v735_v53 = vsel %vm467_vm1, %v730_v51, 0  ;;  %v503_v51 = vld [vmem:[#allocation4] sm:$0xff] }
 0x143   : > { %v554_v33 = vpop.permute.xlu1 %553 }
 0x144   : > { %v559_v34 = vsel %vm467_vm1, %v554_v33, 0 }
 0x145   : > { %568 = vmatpush.bf16.xpose.msrb.mxu3 %v559_v34  ;;  %v515_v34 = vld [vmem:[#allocation5] sm:$0xff] }
 0x14b   : > { %v640_v35 = vpop.permute.xlu1 %639 }
 0x14c   : > { %1061 = vmatmul.msk.bf16.vlgmr.msrb.gmra.mxu1 %vm467_vm1, %v640_v35 }
 0x152   : > { %v483_v36 = vpop.f32.mrf.mxu2 }
 0x153   : > { %v488_v37 = vsel %vm467_vm1, %v483_v36, -inf  ;;  %v728_v54 = vpop.permute.xlu1 %727 }
 0x154   : > { %489 = vmax.xlane.f32.xlu0 %v488_v37 }
 0x15a   : > { %v485_v38 = vpop.f32.mrf.mxu2 }
 0x1c7   : > { %v490_v41 = vpop.xlane.xlu0 %489 }
 0x1c8   : > { %v1685_v42 = vmax.f32 %v1682_v40, %v490_v41 }
 0x1c9   : > { %v1687_v43 = vpop.f32.mrf.mxu1 }
 0x1ca   : > { %v492_v44 = vsub.f32 %v1682_v40, %v1685_v42  ;;  %546 = vst.msk [vmem:[#allocation3] sm:$0xff] %vm545_vm5, %v1685_v42  ;;  %497 = vperm.xlu0 %1200, %v1685_v42   ;;  %v663_v45 = vsel %vm467_vm1, %v1687_v43, -inf }
 0x1cb   : > { %664 = vmax.xlane.f32.xlu1 %v663_v45 }
 0x1cc   : > { %v493_v16 = vmul.f32 1.442695, %v492_v44 }
 0x1d1   : > { %v660_v46 = vpop.f32.mrf.mxu1  ;;  %v574_v2 = vld [vmem:[#allocation3] sm:$0xff] }
 0x1d2   : > { %1205 = vset.pattern.permute.xlu0 %v1487_v63 }
 0x23c   : > { %v498_v47 = vpop.permute.xlu0 %497 }
 0x23d   : > { %v500_v48 = vsub.f32 %v483_v36, %v498_v47 }
 0x23e   : > { %v665_v6 = vpop.xlane.xlu1 %664 }
 0x23f   : > { %v501_v49 = vmul.f32 1.442695, %v500_v48 }
 0x241   : > { %1210 = vpow2.f32 %v501_v49 }
 0x247   : > { %v1695_v50 = vpop.eup %1210 }
 0x248   : > { %v517_v52 = vpack.c.bf16 %v1695_v50, %v1695_v50 }
 0x24a   : > { %1058 = vmatmul.msk.bf16.vlgmr.msra.gmra.mxu3 %vm467_vm1, %v517_v52 }
 0x24b   : > { %744 = vmatpush.bf16.xpose.msra.mxu3 %v735_v53 }
 0x25a   : > { %1059 = vmatmul.msk.bf16.vlgmr.msrb.gmra.mxu3 %vm467_vm1, %v552_v27 }
 0x26a   : > { %1063 = vmatmul.msk.bf16.vlgmr.msra.gmra.mxu3 %vm467_vm1, %v728_v54 }
 0x2cd   : > { %v1703_v55 = vpop.f32.mrf.mxu3 }
 0x2d5   : > { %v541_v56 = vpop.f32.mrf.mxu3 }
 0x2dd   : > { %v1705_v57 = vpop.f32.mrf.mxu3 }
 0x2de   : > { %v575_v58 = vsel %vm467_vm1, %v1705_v57, -inf }
 0x2df   : > { %576 = vmax.xlane.f32.xlu2 %v575_v58 }
 0x2e5   : > { %v572_v59 = vpop.f32.mrf.mxu3 }
 0x2ed   : > { %v1709_v60 = vpop.f32.mrf.mxu3 }
 0x2ee   : > { %v751_v61 = vsel %vm467_vm1, %v1709_v60, -inf }
 0x2ef   : > { %752 = vmax.xlane.f32.xlu0 %v751_v61 }
 0x2f5   : > { %v748_v62 = vpop.f32.mrf.mxu3 }
 0x303   : > { %694 = vrot.lane.b32.xlu0 %v1669_v14, %s1486_s10  ;;  %s1398_s10 = scalar_lea.hbm %s1788_s6, 16 }
 0x304   : > { %p1400_p11 = scmp.lt.s32.totalorder %s1398_s10, %s1394_s27 }
 0x306   : > { %p1401_p12 = por %p1400_p11, %p1399_p10 }
 0x308   : > { %p1402_p13 = pnand %p1401_p12, %p1397_p9 }
 0x352   : > { %v577_v1 = vpop.xlane.xlu2 %576 }
 0x353   : > { %v578_v3 = vmax.f32 %v574_v2, %v577_v1 }
 0x355   : > { %v579_v4 = vsub.f32 %v574_v2, %v578_v3  ;;  %634 = vst.msk [vmem:[#allocation3] sm:$0xff] %vm633_vm6, %v578_v3  ;;  %584 = vperm.xlu2 %1201, %v578_v3  }
 0x357   : > { %v580_v5 = vmul.f32 1.442695, %v579_v4 }
 0x359   : > { %1212 = vpow2.f32 %v580_v5 }
 0x35c   : > { %v662_v7 = vld [vmem:[#allocation3] sm:$0xff] }
 0x35d   : > { %606 = vrot.lane.b32.xlu2 %v1669_v14, %s1489_s14  ;;  %v666_v8 = vmax.f32 %v662_v7, %v665_v6 }
 0x35e   : > { %1203 = vset.pattern.permute.xlu2 %v1490_v9 }
 0x35f   : > { %v1213_v10 = vpop.eup %1212  ;;  %672 = vperm.xlu1 %1202, %v666_v8   ;;  %v667_v11 = vsub.f32 %v662_v7, %v666_v8  ;;  %722 = vst.msk [vmem:[#allocation3] sm:$0xff] %vm721_vm7, %v666_v8 }
 0x360   : > { %593 = vperm.xlu0 %1205, %v1213_v10  }
 0x361   : > { %v668_v12 = vmul.f32 1.442695, %v667_v11 }
 0x362   : > { %v753_v13 = vpop.xlane.xlu0 %752 }
 0x363   : > { %1214 = vpow2.f32 %v668_v12 }
 0x364   : > { %1216 = vpow2.f32 %v493_v16 }
 0x366   : > { %v750_v15 = vld [vmem:[#allocation3] sm:$0xff] }
 0x367   : > { %v754_v17 = vmax.f32 %v750_v15, %v753_v13  ;;  %782 = vrot.lane.b32.xlu1 %v1669_v14, %s1491_s17  ;;  %v510_v14 = vsel %vm467_vm1, %v1695_v50, 0.0  ;;  %v1083_v13 = vld [vmem:[#allocation14 + $0x8] sm:$0xff] }
 0x368   : > { %1206 = vset.pattern.permute.xlu0 %v1488_v0  ;;  %861 = vmatpush.bf16.msra.mxu1 %v1083_v13 }
 0x369   : > { %v1215_v18 = vpop.eup %1214  ;;  %810 = vst.msk [vmem:[#allocation3] sm:$0xff] %vm809_vm8, %v754_v17  ;;  %760 = vperm.xlu2 %1203, %v754_v17   ;;  %v755_v19 = vsub.f32 %v750_v15, %v754_v17  ;;  %v1082_v17 = vld [vmem:[#allocation14] sm:$0xff] }
 0x36a   : > { %681 = vperm.xlu0 %1206, %v1215_v18   ;;  %v1217_v21 = vpop.eup %1216 }
 0x36b   : > { %v756_v20 = vmul.f32 1.442695, %v755_v19 }
 0x36c   : > { %862 = vmatpush.bf16.msra.mxu1 %v1082_v17 }
 0x36d   : > { %1218 = vpow2.f32 %v756_v20 }
 0x371   : > { %1204 = vset.pattern.permute.xlu2 %v1485_v39 }
 0x372   : > { %506 = vperm.xlu2 %1204, %v1217_v21   ;;  %1208 = vset.pattern.permute.xlu0 %v1490_v9 }
 0x373   : > { %v1219_v24 = vpop.eup %1218 }
 0x375   : > { %v695_v22 = vpop.permute.xlu0 %694 }
 0x376   : > { %v700_v23 = vsel %vm526_vm3, %v695_v22, 0 }
 0x377   : > { %709 = vmatpush.bf16.msrb.mxu2 %v700_v23 }
 0x37a   : > { %1207 = vset.pattern.permute.xlu2 %v1490_v9 }
 0x37b   : > { %769 = vperm.xlu2 %1207, %v1219_v24  }
 0x391   : > { %511 = vadd.xlane.f32.xlu1 %v510_v14 }
 0x3af   : > { %v585_v25 = vpop.permute.xlu2 %584 }
 0x3b0   : > { %v587_v26 = vsub.f32 %v1705_v57, %v585_v25 }
 0x3b2   : > { %v588_v27 = vmul.f32 1.442695, %v587_v26 }
 0x3b4   : > { %1220 = vpow2.f32 %v588_v27 }
 0x3b7   : > { %v607_v28 = vpop.permute.xlu2 %606 }
 0x3b8   : > { %v612_v29 = vsel %vm526_vm3, %v607_v28, 0 }
 0x3b9   : > { %621 = vmatpush.bf16.msrb.mxu0 %v612_v29 }
 0x3ba   : > { %v1221_v30 = vpop.eup %1220 }
 0x3bb   : > { %v597_v31 = vsel %vm467_vm1, %v1221_v30, 0.0  ;;  %v605_v32 = vpack.c.bf16 %v1221_v30, %v1221_v30 }
 0x3bc   : > { %598 = vadd.xlane.f32.xlu2 %v597_v31 }
 0x3bd   : > { %1060 = vmatmul.msk.bf16.vlgmr.msrb.gmra.mxu0 %vm467_vm1, %v605_v32 }
 0x3c3   : > { %v761_v33 = vpop.permute.xlu2 %760 }
 0x3c4   : > { %v763_v35 = vsub.f32 %v1709_v60, %v761_v33 }
 0x3c6   : > { %v764_v38 = vmul.f32 1.442695, %v763_v35 }
 0x3c8   : > { %1222 = vpow2.f32 %v764_v38 }
 0x3cc   : > { %v507_v36 = vpop.permute.xlu2 %506 }
 0x3cd   : > { %v516_v37 = vmul.f32 %v515_v34, %v507_v36 }
 0x3ce   : > { %v1223_v44 = vpop.eup %1222 }
 0x3cf   : > { %v543_v39 = vadd.f32 %v1703_v55, %v516_v37  ;;  %v781_v48 = vpack.c.bf16 %v1223_v44, %v1223_v44  ;;  %v773_v6 = vsel %vm467_vm1, %v1223_v44, 0.0 }
 0x3d1   : > { %544 = vst.msk [vmem:[#allocation5] sm:$0xff] %vm467_vm1, %v543_v39  ;;  %v673_v40 = vpop.permute.xlu1 %672 }
 0x3d2   : > { %v675_v41 = vsub.f32 %v1687_v43, %v673_v40  ;;  %v509_v43 = vmul.f32 %v507_v36, %v503_v51  ;;  %v594_v56 = vpop.permute.xlu0 %593  ;;  %v1209_v40 = vld [vmem:[%s1787_s5] ss:$0 sm:$0xff] }
 0x3d4   : > { %v676_v42 = vmul.f32 1.442695, %v675_v41 }
 0x3d5   : > { %v770_v54 = vpop.permute.xlu2 %769 }
 0x3d6   : > { %1224 = vpow2.f32 %v676_v42 }
 0x3d8   : > { %v603_v8 = vld [vmem:[#allocation5] sm:$0xff] }
 0x3d9   : > { %v783_v45 = vpop.permute.xlu1 %782  ;;  %v604_v9 = vmul.f32 %v603_v8, %v594_v56 }
 0x3da   : > { %v788_v46 = vsel %vm526_vm3, %v783_v45, 0 }
 0x3db   : > { %797 = vmatpush.bf16.msra.mxu0 %v788_v46 }
 0x3dc   : > { %v1225_v47 = vpop.eup %1224  ;;  %v682_v62 = vpop.permute.xlu0 %681 }
 0x3dd   : > { %v685_v49 = vsel %vm467_vm1, %v1225_v47, 0.0  ;;  %v693_v50 = vpack.c.bf16 %v1225_v47, %v1225_v47 }
 0x3de   : > { %1064 = vmatmul.msk.bf16.vlgmr.msra.gmra.mxu0 %vm467_vm1, %v781_v48  ;;  %686 = vadd.xlane.f32.xlu0 %v685_v49 }
 0x3df   : > { %1062 = vmatmul.msk.bf16.vlgmr.msrb.gmra.mxu2 %vm467_vm1, %v693_v50 }
 0x404   : > { %v512_v52 = vpop.xlane.xlu1 %511 }
 0x405   : > { %v513_v53 = vadd.f32 %v512_v52, %v509_v43 }
 0x407   : > { %514 = vst.msk [vmem:[#allocation4] sm:$0xff] %vm467_vm1, %v513_v53 }
 0x40e   : > { %v590_v55 = vld [vmem:[#allocation4] sm:$0xff] }
 0x40f   : > { %v596_v57 = vmul.f32 %v594_v56, %v590_v55 }
 0x42f   : > { %v599_v58 = vpop.xlane.xlu2 %598 }
 0x430   : > { %v600_v59 = vadd.f32 %v599_v58, %v596_v57 }
 0x432   : > { %602 = vst.msk [vmem:[#allocation4] sm:$0xff] %vm601_vm9, %v600_v59 }
 0x439   : > { %v678_v63 = vld [vmem:[#allocation4] sm:$0xff] }
 0x43a   : > { %v623_v60 = vpop.f32.mrf.mxu0  ;;  %v684_v0 = vmul.f32 %v682_v62, %v678_v63 }
 0x43b   : > { %628 = vrot.lane.b32.xlu1 %v623_v60, %s1492_s20 }
 0x442   : > { %v625_v61 = vpop.f32.mrf.mxu0 }
 0x451   : > { %v687_v1 = vpop.xlane.xlu0 %686 }
 0x452   : > { %v688_v2 = vadd.f32 %v687_v1, %v684_v0 }
 0x454   : > { %690 = vst.msk [vmem:[#allocation4] sm:$0xff] %vm689_vm10, %v688_v2 }
 0x45b   : > { %v799_v3 = vpop.f32.mrf.mxu0  ;;  %v766_v23 = vld [vmem:[#allocation4] sm:$0xff] }
 0x45c   : > { %804 = vrot.lane.b32.xlu0 %v799_v3, %s1493_s28  ;;  %v772_v24 = vmul.f32 %v770_v54, %v766_v23 }
 0x462   : > { %v711_v4 = vpop.f32.mrf.mxu2 }
 0x463   : > { %716 = vrot.lane.b32.xlu2 %v711_v4, %s1494_s29  ;;  %v801_v5 = vpop.f32.mrf.mxu0 }
 0x465   : > { %774 = vadd.xlane.f32.xlu1 %v773_v6 }
 0x46a   : > { %v713_v7 = vpop.f32.mrf.mxu2 }
 0x4ad   : > { %v629_v10 = vpop.permute.xlu1 %628 }
 0x4ae   : > { %v631_v11 = vadd.f32 %v629_v10, %v604_v9 }
 0x4b0   : > { %632 = vst.msk [vmem:[#allocation5] sm:$0xff] %vm601_vm9, %v631_v11 }
 0x4b7   : > { %v691_v12 = vld [vmem:[#allocation5] sm:$0xff] }
 0x4b8   : > { %v692_v15 = vmul.f32 %v691_v12, %v682_v62 }
 0x4bd   : > { %v717_v16 = vpop.permute.xlu2 %716 }
 0x4be   : > { %v719_v18 = vadd.f32 %v717_v16, %v692_v15 }
 0x4c0   : > { %720 = vst.msk [vmem:[#allocation5] sm:$0xff] %vm689_vm10, %v719_v18 }
 0x4c7   : > { %v779_v19 = vld [vmem:[#allocation5] sm:$0xff] }
 0x4c8   : > { %v780_v20 = vmul.f32 %v779_v19, %v770_v54 }
 0x4ce   : > { %v805_v21 = vpop.permute.xlu0 %804 }
 0x4cf   : > { %v807_v22 = vadd.f32 %v805_v21, %v780_v20 }
 0x4d1   : > { %808 = vst.msk [vmem:[#allocation5] sm:$0xff] %vm777_vm11, %v807_v22 }
 0x4d8   : > { %v775_v14 = vpop.xlane.xlu1 %774  ;;  %v814_v36 = vld [vmem:[#allocation5] sm:$0xff] }
 0x4d9   : > { %v776_v25 = vadd.f32 %v775_v14, %v772_v24 }
 0x4db   : > { %778 = vst.msk [vmem:[#allocation4] sm:$0xff] %vm777_vm11, %v776_v25 }
 0x4e2   : > { %v815_v26 = vld [vmem:[#allocation4] sm:$0xff] }
 0x4e3   : > { %1226 = vrcp.f32 %v815_v26  ;;  %v827_v30 = vand.u32 2147483648, %v815_v26  ;;  %v825_v32 = vand.u32 2147483647, %v815_v26  ;;  %vm821_vm13 = vweird.f32 %v815_v26 }
 0x4e5   : > { %v828_v34 = vor.u32 1.1754944e-38, %v827_v30  ;;  %vm826_vm15 = vcmp.eq.f32.partialorder %v825_v32, 8.507059e+37 }
 0x4e9   : > { %v1227_v27 = vpop.eup %1226 }
 0x4ea   : > { %v817_v28 = vmul.f32 %v1227_v27, %v815_v26  ;;  %vm822_vm12 = vweird.f32 %v1227_v27 }
 0x4eb   : > { %vm823_vm14 = vmor %vm821_vm13, %vm822_vm12 }
 0x4ec   : > { %v818_v29 = vsub.f32 1.0, %v817_v28 }
 0x4ee   : > { %v819_v31 = vmul.f32 %v1227_v27, %v818_v29 }
 0x4f0   : > { %v820_v33 = vadd.f32 %v1227_v27, %v819_v31 }
 0x4f2   : > { %v824_v35 = vsel %vm823_vm14, %v1227_v27, %v820_v33 }
 0x4f3   : > { %v829_v37 = vsel %vm826_vm15, %v828_v34, %v824_v35 }
 0x4f4   : > { %v830_v38 = vmul.f32 %v829_v37, %v814_v36 }
 0x4f6   : > { %v831_v39 = vpack.c.bf16 %v830_v38, %v830_v38 }
 0x4f8   : > { %1073 = vmatmul.msk.bf16.vlgmr.msra.gmra.mxu1 %vm406_vm0, %v831_v39 }
 0x575   : > { %v864_v41 = vpop.f32.mrf.mxu1 }
 0x576   : > { %v865_v42 = vadd.f32 %v1209_v40, %v864_v41 }
 0x578   : > { %868 = vst.msk [vmem:[%s383_s3] sm:$0xff] %vm406_vm0, %v865_v42 }
 0x579   : > { %1405 = shalt.err (!%p1402_p13)
}
 0x57a   : > { %1100 = dma.vmem_to_hbm [thread:$0]  (%p1617_p4), %s884_s4, 128, %s886_s23, %s870_s24  }
 0x57d   : > { %v866_v44 = vpop.f32.mrf.mxu1 }
 0x57e PF: > { %s897_s11 = sand.u32 1, %s1452_s21   ;;  %p1120_p0 = pnand %p1027_p6, %p1625_p7 }
 0x57f   : > { %s898_s20 = scalar_lea.sflag [#allocation8], %s897_s11 }
 0x580   : > { %p1121_p2 = pneg %p1120_p0 }
 0x582   : > { %1447 = dma.done.wait (%p1121_p2), %s898_s20, 128  }
 0x583   : > { %1449 = vsyncadd (%p1121_p2), %s898_s20, 4294967168  ;;  %s26_s26 = sadd.s32 1, %s1472_s26   ;;  %s1808_s28 = sld [smem:[#allocation21_spill]] }
 0x584   : > { %p23_p5 = scmp.ge.s32.totalorder %s26_s26, 4   ;;  %s1809_s23 = sld [smem:[#allocation24_spill]] }
 0x585   : > { %s1810_s24 = sld [smem:[#allocation22_spill]]  ;;  %s1812_s21 = smov %s1456_s22 }
 0x586   : > { %s1811_s25 = sld [smem:[#allocation23_spill]]  ;;  %25 = sbr.rel (!%p23_p5) target bundleno = 13 (0xd), region = 122 }
 0x589   : > { %s1813_s22 = smov %s1808_s28 }
 0x58b   :  { %904 = vsyncpa [#allocation7], 1 }
 0x58c   :  { %906 = vsyncpa [#allocation7 + $0x1], 1 }
 0x58d   :  { %907 = vsyncpa [#allocation10], 1 }
 0x58e   :  { %909 = vsyncpa [#allocation10 + $0x1], 1 }
 0x58f   :  { %910 = vsyncpa [#allocation13], 1 }
 0x590   :  { %911 = vsyncpa [#allocation8], 1 }
 0x591   :  { %913 = vsyncpa [#allocation8 + $0x1], 1 }

</bundles_post_ra>
